<compile_context>
chip_gen: v6e
topology: v6e:2x2x1
jax: 0.10.0
libtpu: 0.0.40
codegen_flags: <defaults>
</compile_context>

<pallas_src>
import functools

import jax
import jax.numpy as jnp
import numpy as np
from jax.experimental import pallas as pl
from jax.experimental.pallas import tpu as pltpu


# ---------------------------------------------------------------------------
# Kernels
# ---------------------------------------------------------------------------

def _ffn_resident_kernel(x_ref, w1_ref, b1_ref, w2_ref, b2_ref, o_ref):
    # x_ref:  (tm, d_model)      VMEM tile of input rows
    # w1_ref: (d_model, hidden)  resident, single-buffered
    # b1_ref: (1, hidden)
    # w2_ref: (hidden, d_model)  resident, single-buffered
    # b2_ref: (1, d_model)
    x = x_ref[...]
    h = jnp.dot(x, w1_ref[...], preferred_element_type=jnp.float32)
    h = jnp.maximum(h + b1_ref[...].astype(jnp.float32), 0.0)
    # Cast the intermediate to the weight dtype so the second matmul takes the
    # fast low-precision MXU path when computing in bf16 (no-op for f32).
    h = h.astype(w2_ref.dtype)
    out = jnp.dot(h, w2_ref[...], preferred_element_type=jnp.float32)
    out = out + b2_ref[...].astype(jnp.float32)
    o_ref[...] = out.astype(o_ref.dtype)


def _ffn_streamed_kernel(x_ref, w1_ref, b1_ref, w2_ref, b2_ref, o_ref, acc_ref):
    # Grid = (row_tiles, hidden_chunks); hidden chunk axis is a reduction for
    # the second matmul, accumulated into acc_ref (f32, VMEM scratch).
    # x_ref:  (tm, d_model)
    # w1_ref: (d_model, tk)   streamed chunk
    # b1_ref: (1, tk)
    # w2_ref: (tk, d_model)   streamed chunk
    # b2_ref: (1, d_model)
    # acc_ref:(tm, d_model)   f32 accumulator
    k = pl.program_id(1)

    @pl.when(k == 0)
    def _init():
        acc_ref[...] = jnp.zeros_like(acc_ref)

    h = jnp.dot(x_ref[...], w1_ref[...], preferred_element_type=jnp.float32)
    h = jnp.maximum(h + b1_ref[...].astype(jnp.float32), 0.0)
    h = h.astype(w2_ref.dtype)
    acc_ref[...] += jnp.dot(h, w2_ref[...], preferred_element_type=jnp.float32)

    @pl.when(k == pl.num_programs(1) - 1)
    def _store():
        o_ref[...] = (acc_ref[...] + b2_ref[...].astype(jnp.float32)).astype(o_ref.dtype)


# ---------------------------------------------------------------------------
# Host-side planning helpers
# ---------------------------------------------------------------------------

def _round_up(a: int, b: int) -> int:
    return ((a + b - 1) // b) * b


def _cdiv(a: int, b: int) -> int:
    return (a + b - 1) // b


def _min_sublane(dtype) -> int:
    # Sublane packing: 8 rows for 4-byte types, 16 for bf16, 32 for 1-byte types.
    return max(8, 32 // np.dtype(dtype).itemsize)


def _vmem_cap_bytes() -> int:
    """Per-TensorCore VMEM capacity; conservative 64 MiB (v7x) fallback."""
    try:
        info = pltpu.get_tpu_info()
        cap = int(getattr(info, "vmem_capacity_bytes", 0) or 0)
        if cap > 0:
            return cap
    except Exception:
        pass
    return 64 << 20


_TK_CANDIDATES = (4096, 2048, 1024, 512, 256, 128)


# ---------------------------------------------------------------------------
# Public wrapper
# ---------------------------------------------------------------------------

@functools.partial(jax.jit,
                   static_argnames=("block_rows", "compute_dtype", "force_stream"))
def pointwise_ffn(x, w1, b1, w2, b2, *, block_rows=None, compute_dtype=None,
                  force_stream=False):
    """Position-wise feed-forward network: max(0, x@W1+b1)@W2 + b2.

    Args:
      x:  [..., d_model]
      w1: [d_model, hidden_dim]  (transposed relative to torch Linear.weight)
      b1: [hidden_dim]
      w2: [hidden_dim, d_model]
      b2: [d_model]
      block_rows: optional row-tile override.
      compute_dtype: optional matmul dtype (e.g. jnp.bfloat16) — biases/accum
        stay f32, output keeps x's dtype. Mixed-precision vs an f32 reference.
      force_stream: force the streamed hidden-axis path (testing / v7x).
    Returns:
      [..., d_model], same dtype as the input x.
    """
    out_dtype = x.dtype
    if compute_dtype is not None:
        x = x.astype(compute_dtype)
        w1 = w1.astype(compute_dtype)
        w2 = w2.astype(compute_dtype)

    d_model = x.shape[-1]
    hidden = w1.shape[-1]
    lead = x.shape[:-1]
    x2 = x.reshape(-1, d_model)
    m = x2.shape[0]

    b1_2d = b1.reshape(1, hidden)
    b2_2d = b2.reshape(1, d_model)

    isz_c = x2.dtype.itemsize          # activation / compute dtype
    isz_w = w1.dtype.itemsize
    isz_b = b1.dtype.itemsize
    isz_o = np.dtype(out_dtype).itemsize

    cap = _vmem_cap_bytes()
    budget = (cap * 3) // 4            # ≈48 MiB on v7x, ≈96 MiB on v5e/v6e
    sub = _min_sublane(x2.dtype)
    max_tm = max(sub, _round_up(m, sub))

    def _clip(t):
        return max(sub, min(int(t), max_tm))

    tm_cands = [block_rows] if block_rows is not None else [512, 256, 128]
    tm_cands = sorted({_clip(t) for t in tm_cands}, reverse=True)

    def resident_need(tm):
        iobuf = 1 if _cdiv(m, tm) == 1 else 2          # single-step -> Buffered(1)
        return (iobuf * tm * d_model * (isz_c + isz_o)  # x / out tiles
                + 2 * d_model * hidden * isz_w          # W1 + W2, one copy each
                + (hidden + d_model) * isz_b            # biases
                + tm * hidden * (4 + isz_c)             # f32 h + cast h
                + tm * d_model * 4)                     # f32 pre-cast output

    def streamed_need(tm, tk):
        return (2 * tm * d_model * (isz_c + isz_o)      # x / out tiles (dbl-buf)
                + 4 * d_model * tk * isz_w              # W1 + W2 chunks (dbl-buf)
                + 2 * tk * isz_b + d_model * isz_b      # bias chunks
                + tm * d_model * 4                      # f32 accumulator scratch
                + tm * tk * (4 + isz_c)                 # f32 h + cast h
                + tm * d_model * 4)                     # f32 pre-cast output

    tks = [t for t in _TK_CANDIDATES if t <= hidden and hidden % t == 0]

    plan = None
    if not force_stream or not tks:
        for tm in tm_cands:
            if resident_need(tm) <= budget:
                plan = ("resident", tm, None)
                break
        if plan is None and not tks:
            # Streaming impossible (hidden not a multiple of 128): best effort.
            plan = ("resident", tm_cands[-1], None)
    if plan is None:
        tk_order = tks
        if force_stream:
            multi = [t for t in tks if hidden // t >= 2]
            tk_order = multi or tks
        for tm in tm_cands:
            for tk in tk_order:
                if streamed_need(tm, tk) <= budget:
                    plan = ("streamed", tm, tk)
                    break
            if plan is not None:
                break
        if plan is None:
            plan = ("streamed", tm_cands[-1], tk_order[-1])

    mode, tm, tk = plan
    n_rows = _cdiv(m, tm)
    need = resident_need(tm) if mode == "resident" else streamed_need(tm, tk)

    # Per-generation VMEM request: sized from actual residency, capped below
    # the physical per-core capacity with headroom for Mosaic internal scratch.
    vmem_limit = int(min(max(need * 1.25 + (2 << 20), 16 << 20), cap - (4 << 20)))

    weight_bytes = 2 * d_model * hidden * isz_w + (hidden + d_model) * isz_b
    weight_passes = 1 if mode == "resident" else n_rows
    cost = pl.CostEstimate(
        flops=4 * m * d_model * hidden,
        transcendentals=0,
        bytes_accessed=m * d_model * (isz_c + isz_o) + weight_passes * weight_bytes,
    )

    if mode == "resident":
        single = n_rows == 1

        def io_spec(shape, imap):
            if single:  # one grid step: double-buffering x/out only wastes VMEM
                return pl.BlockSpec(shape, imap,
                                    pipeline_mode=pl.Buffered(buffer_count=1))
            return pl.BlockSpec(shape, imap)

        def resident_spec(shape):
            return pl.BlockSpec(shape, lambda i: (0, 0),
                                pipeline_mode=pl.Buffered(buffer_count=1))

        out2 = pl.pallas_call(
            _ffn_resident_kernel,
            out_shape=jax.ShapeDtypeStruct((m, d_model), out_dtype),
            grid_spec=pltpu.PrefetchScalarGridSpec(
                num_scalar_prefetch=0,
                grid=(n_rows,),
                in_specs=[
                    io_spec((tm, d_model), lambda i: (i, 0)),       # x rows
                    resident_spec((d_model, hidden)),                # W1
                    resident_spec((1, hidden)),                      # b1
                    resident_spec((hidden, d_model)),                # W2
                    resident_spec((1, d_model)),                     # b2
                ],
                out_specs=io_spec((tm, d_model), lambda i: (i, 0)),
            ),
            compiler_params=pltpu.CompilerParams(
                dimension_semantics=("parallel",),
                vmem_limit_bytes=vmem_limit,
            ),
            cost_estimate=cost,
        )(x2, w1, b1_2d, w2, b2_2d)
    else:
        n_k = hidden // tk
        out2 = pl.pallas_call(
            _ffn_streamed_kernel,
            out_shape=jax.ShapeDtypeStruct((m, d_model), out_dtype),
            grid_spec=pltpu.PrefetchScalarGridSpec(
                num_scalar_prefetch=0,
                grid=(n_rows, n_k),
                in_specs=[
                    pl.BlockSpec((tm, d_model), lambda i, k: (i, 0)),  # x rows
                    pl.BlockSpec((d_model, tk), lambda i, k: (0, k)),  # W1 chunk
                    pl.BlockSpec((1, tk), lambda i, k: (0, k)),        # b1 chunk
                    pl.BlockSpec((tk, d_model), lambda i, k: (k, 0)),  # W2 chunk
                    pl.BlockSpec((1, d_model), lambda i, k: (0, 0),    # b2
                                 pipeline_mode=pl.Buffered(buffer_count=1)),
                ],
                out_specs=pl.BlockSpec((tm, d_model), lambda i, k: (i, 0)),
                scratch_shapes=[pltpu.VMEM((tm, d_model), jnp.float32)],
            ),
            compiler_params=pltpu.CompilerParams(
                dimension_semantics=("parallel", "arbitrary"),
                vmem_limit_bytes=vmem_limit,
            ),
            cost_estimate=cost,
        )(x2, w1, b1_2d, w2, b2_2d)

    return out2.reshape(*lead, d_model)


# ---------------------------------------------------------------------------
# Reference + test harness
# ---------------------------------------------------------------------------

def _reference(x, w1, b1, w2, b2):
    hi = jax.lax.Precision.HIGHEST
    h = jnp.maximum(jnp.dot(x, w1, precision=hi) + b1, 0.0)
    return jnp.dot(h, w2, precision=hi) + b2


def _make_params(key, d_model, hidden_dim):
    kw1, kb1, kw2, kb2 = jax.random.split(key, 4)
    lim1 = 1.0 / (d_model ** 0.5)
    lim2 = 1.0 / (hidden_dim ** 0.5)
    w1 = jax.random.uniform(kw1, (d_model, hidden_dim), jnp.float32, -lim1, lim1)
    b1 = jax.random.uniform(kb1, (hidden_dim,), jnp.float32, -lim1, lim1)
    w2 = jax.random.uniform(kw2, (hidden_dim, d_model), jnp.float32, -lim2, lim2)
    b2 = jax.random.uniform(kb2, (d_model,), jnp.float32, -lim2, lim2)
    return w1, b1, w2, b2


if __name__ == "__main__":
    key = jax.random.PRNGKey(0)
    k1, k2, k3, k4, k5, k6 = jax.random.split(key, 6)

    # Tolerance notes: MXU matmul precision for f32 inputs may not be bit-exact
    # vs Precision.HIGHEST; structural bugs would produce O(1) errors anyway.
    ATOL, RTOL = 2e-2, 1e-3

    # Case 1: tiny shapes (single row tile -> single-buffered I/O, resident path).
    batch, seq, d_model, hidden_dim = 2, 8, 32, 64
    x = jax.random.normal(k1, (batch, seq, d_model), dtype=jnp.float32)
    w1, b1, w2, b2 = _make_params(k2, d_model, hidden_dim)
    out = jax.block_until_ready(pointwise_ffn(x, w1, b1, w2, b2))
    ref = _reference(x, w1, b1, w2, b2)
    assert out.shape == x.shape and out.dtype == x.dtype
    assert jnp.allclose(out, ref, atol=ATOL, rtol=RTOL)

    # Case 2: lane-dense d_model, non-tile-aligned row count
    # (ragged last block handled by Pallas, no host-side pad/slice).
    batch, seq, d_model, hidden_dim = 3, 37, 128, 256
    x = jax.random.normal(k3, (batch, seq, d_model), dtype=jnp.float32)
    w1, b1, w2, b2 = _make_params(k4, d_model, hidden_dim)
    out = jax.block_until_ready(pointwise_ffn(x, w1, b1, w2, b2))
    ref = _reference(x, w1, b1, w2, b2)
    assert out.shape == x.shape
    assert jnp.allclose(out, ref, atol=ATOL, rtol=RTOL)

    # Case 3: force the streamed hidden-axis path (v7x-style accumulator),
    # with a ragged row count as regression coverage.
    batch, seq, d_model, hidden_dim = 2, 37, 128, 256
    x = jax.random.normal(k5, (batch, seq, d_model), dtype=jnp.float32)
    w1, b1, w2, b2 = _make_params(k6, d_model, hidden_dim)
    out = jax.block_until_ready(pointwise_ffn(x, w1, b1, w2, b2, force_stream=True))
    ref = _reference(x, w1, b1, w2, b2)
    assert out.shape == x.shape
    assert jnp.allclose(out, ref, atol=ATOL, rtol=RTOL)

    # Case 4: bf16 compute mode (mixed precision -> loose tolerance).
    out_bf16 = jax.block_until_ready(
        pointwise_ffn(x, w1, b1, w2, b2, compute_dtype=jnp.bfloat16))
    assert out_bf16.dtype == x.dtype
    assert jnp.allclose(out_bf16, ref, atol=1e-1, rtol=1e-1)

    print("KERNEL_OK")
</pallas_src>

<mosaic_0001>
module attributes {stable_mosaic.version = 11 : i64} {
  func.func @_ffn_resident_kernel(%arg0: i32, %arg1: memref<16x32xf32, #tpu.memory_space<vmem>>, %arg2: memref<32x64xf32, #tpu.memory_space<vmem>>, %arg3: memref<1x64xf32, #tpu.memory_space<vmem>>, %arg4: memref<64x32xf32, #tpu.memory_space<vmem>>, %arg5: memref<1x32xf32, #tpu.memory_space<vmem>>, %arg6: memref<16x32xf32, #tpu.memory_space<vmem>>) attributes {dimension_semantics = [#tpu.dimension_semantics<parallel>], iteration_bounds = array<i64: 1>, scalar_prefetch = 0 : i64, scratch_operands = 0 : i64, tpu.core_type = #tpu.core_type<tc>, window_params = [{pipeline_mode = #tpu.pipeline_mode<synchronous>, transform_indices = @transform_0, window_bounds = array<i64: 16, 32>}, {pipeline_mode = #tpu.pipeline_mode<synchronous>, transform_indices = @transform_1, window_bounds = array<i64: 32, 64>}, {pipeline_mode = #tpu.pipeline_mode<synchronous>, transform_indices = @transform_2, window_bounds = array<i64: 1, 64>}, {pipeline_mode = #tpu.pipeline_mode<synchronous>, transform_indices = @transform_3, window_bounds = array<i64: 64, 32>}, {pipeline_mode = #tpu.pipeline_mode<synchronous>, transform_indices = @transform_4, window_bounds = array<i64: 1, 32>}, {pipeline_mode = #tpu.pipeline_mode<synchronous>, transform_indices = @transform_5, window_bounds = array<i64: 16, 32>}]} {
    %c0 = arith.constant 0 : index
    %c0_0 = arith.constant 0 : index
    %0 = vector.load %arg1[%c0, %c0_0] : memref<16x32xf32, #tpu.memory_space<vmem>>, vector<16x32xf32>
    %c0_1 = arith.constant 0 : index
    %c0_2 = arith.constant 0 : index
    %1 = vector.load %arg2[%c0_1, %c0_2] : memref<32x64xf32, #tpu.memory_space<vmem>>, vector<32x64xf32>
    %cst = arith.constant dense<0.000000e+00> : vector<16x64xf32>
    %2 = tpu.matmul %0, %1, %cst {dimension_numbers = #tpu.dot_dimension_numbers<[1], [0], [0], [1], [0, 0, 1, 1], [], []>} : vector<16x32xf32>, vector<32x64xf32>, vector<16x64xf32> -> vector<16x64xf32>
    %c0_3 = arith.constant 0 : index
    %c0_4 = arith.constant 0 : index
    %3 = vector.load %arg3[%c0_3, %c0_4] : memref<1x64xf32, #tpu.memory_space<vmem>>, vector<1x64xf32>
    %4 = vector.broadcast %3 : vector<1x64xf32> to vector<16x64xf32>
    %5 = arith.addf %2, %4 : vector<16x64xf32>
    %cst_5 = arith.constant 0.000000e+00 : f32
    %6 = vector.broadcast %cst_5 : f32 to vector<16x64xf32>
    %7 = arith.maximumf %5, %6 : vector<16x64xf32>
    %c0_6 = arith.constant 0 : index
    %c0_7 = arith.constant 0 : index
    %8 = vector.load %arg4[%c0_6, %c0_7] : memref<64x32xf32, #tpu.memory_space<vmem>>, vector<64x32xf32>
    %cst_8 = arith.constant dense<0.000000e+00> : vector<16x32xf32>
    %9 = tpu.matmul %7, %8, %cst_8 {dimension_numbers = #tpu.dot_dimension_numbers<[1], [0], [0], [1], [0, 0, 1, 1], [], []>} : vector<16x64xf32>, vector<64x32xf32>, vector<16x32xf32> -> vector<16x32xf32>
    %c0_9 = arith.constant 0 : index
    %c0_10 = arith.constant 0 : index
    %10 = vector.load %arg5[%c0_9, %c0_10] : memref<1x32xf32, #tpu.memory_space<vmem>>, vector<1x32xf32>
    %11 = vector.broadcast %10 : vector<1x32xf32> to vector<16x32xf32>
    %12 = arith.addf %9, %11 : vector<16x32xf32>
    %c0_11 = arith.constant 0 : index
    %c0_12 = arith.constant 0 : index
    %13 = vector.load %arg6[%c0_11, %c0_12] : memref<16x32xf32, #tpu.memory_space<vmem>>, vector<16x32xf32>
    tpu.vector_store %arg6[%c0_11, %c0_12], %12 {strides = array<i32>} : memref<16x32xf32, #tpu.memory_space<vmem>>, vector<16x32xf32>,
    return
  }
  func.func @transform_0(%arg0: i32) -> (i32, i32) {
    %c0_i32 = arith.constant 0 : i32
    %c0_i32_0 = arith.constant 0 : i32
    return %arg0, %c0_i32 : i32, i32
  }
  func.func @transform_1(%arg0: i32) -> (i32, i32) {
    %c0_i32 = arith.constant 0 : i32
    %c0_i32_0 = arith.constant 0 : i32
    %c0_i32_1 = arith.constant 0 : i32
    return %c0_i32, %c0_i32_0 : i32, i32
  }
  func.func @transform_2(%arg0: i32) -> (i32, i32) {
    %c0_i32 = arith.constant 0 : i32
    %c0_i32_0 = arith.constant 0 : i32
    %c0_i32_1 = arith.constant 0 : i32
    return %c0_i32, %c0_i32_0 : i32, i32
  }
  func.func @transform_3(%arg0: i32) -> (i32, i32) {
    %c0_i32 = arith.constant 0 : i32
    %c0_i32_0 = arith.constant 0 : i32
    %c0_i32_1 = arith.constant 0 : i32
    return %c0_i32, %c0_i32_0 : i32, i32
  }
  func.func @transform_4(%arg0: i32) -> (i32, i32) {
    %c0_i32 = arith.constant 0 : i32
    %c0_i32_0 = arith.constant 0 : i32
    %c0_i32_1 = arith.constant 0 : i32
    return %c0_i32, %c0_i32_0 : i32, i32
  }
  func.func @transform_5(%arg0: i32) -> (i32, i32) {
    %c0_i32 = arith.constant 0 : i32
    %c0_i32_0 = arith.constant 0 : i32
    return %arg0, %c0_i32 : i32, i32
  }
}

</mosaic_0001>

<bundles_post_ra>
// kernel: pointwise_ffn.1
= control target key start
LH: loop header
LB: loop body
LE: loop exit
PB: predicated region body
PF: predicated region fallthrough
CT: control target
= control target key end

     0   :  { %vm34_vm0 = vcmask 261120   ;;  %s398_s0 = inlined_call_operand.vmem [shape: f32[16,32], index: 0, kind: input, shape index: {}]   ;;  %s399_s1 = inlined_call_operand.vmem [shape: f32[32,64], index: 1, kind: input, shape index: {}]   ;;  %s400_s2 = inlined_call_operand.vmem [shape: f32[1,64], index: 2, kind: input, shape index: {}]   ;;  %s401_s3 = inlined_call_operand.vmem [shape: f32[64,32], index: 3, kind: input, shape index: {}]   ;;  %s402_s4 = inlined_call_operand.vmem [shape: f32[1,32], index: 4, kind: input, shape index: {}]   ;;  %s403_s5 = inlined_call_operand.hbm [shape: f32[16,32], index: 5, kind: output, shape index: {}]  }
   0x1   :  { %v26_v0 = vld [vmem:[%s399_s1 + $0x18] sm:$0xff]  ;;  %v25_v1 = vld [vmem:[%s399_s1 + $0x10] sm:$0xff]  ;;  %v21_v2 = vld [vmem:[%s398_s0] sm:$0xff] }
   0x2   :  { %255 = vmatprep.subr.mxu0 %v26_v0  ;;  %v24_v3 = vld [vmem:[%s399_s1 + $0x8] sm:$0xff]  ;;  %263 = vmatprep.mubr.msk.f32.mxu0 %vm34_vm0, %v21_v2  ;;  %v125_v4 = vld [vmem:[%s401_s3 + $0x38] sm:$0xff]  ;;  %v124_v5 = vld [vmem:[%s401_s3 + $0x30] sm:$0xff] }
   0x3   :  { %256 = vmatpush3.msra.mxu0 %v26_v0  ;;  %266 = vmatprep.subr.mxu1 %v125_v4 }
   0x4   :  { %257 = vmatprep.subr.mxu0 %v25_v1 }
   0x5   :  { %10 = vsyncpa [#allocation3], 0  ;;  %258 = vmatpush3.msra.mxu0 %v25_v1  ;;  %v23_v6 = vld [vmem:[%s399_s1] sm:$0xff]  ;;  %267 = vmatpush3.msra.mxu1 %v125_v4  ;;  %v123_v7 = vld [vmem:[%s401_s3 + $0x28] sm:$0xff]  ;;  %vm133_vm1 = vcmask 523264  }
   0x6   :  { %259 = vmatprep.subr.mxu0 %v24_v3  ;;  %268 = vmatprep.subr.mxu1 %v124_v5  ;;  %v22_v8 = vld [vmem:[%s398_s0 + $0x8] sm:$0xff]  ;;  %v122_v9 = vld [vmem:[%s401_s3 + $0x20] sm:$0xff]  ;;  %v121_v10 = vld [vmem:[%s401_s3 + $0x18] sm:$0xff] }
   0x7   :  { %260 = vmatpush3.msra.mxu0 %v24_v3  ;;  %269 = vmatpush3.msra.mxu1 %v124_v5  ;;  %v120_v11 = vld [vmem:[%s401_s3 + $0x10] sm:$0xff]  ;;  %v119_v12 = vld [vmem:[%s401_s3 + $0x8] sm:$0xff]  ;;  %v118_v13 = vld [vmem:[%s401_s3] sm:$0xff]  ;;  %s310_s3 = smov [#allocation2]  }
   0x8   :  { %261 = vmatprep.subr.mxu0 %v23_v6  ;;  %270 = vmatprep.subr.mxu1 %v123_v7  ;;  %v233_v14 = vld [vmem:[%s400_s2] ss:$0 sm:$0xff]  ;;  %s222_s23 = sshll.u32 %s310_s3, 4  ;;  %s223_s23 = int_to_ptr.vmem [resolvable:$true] %s222_s23 }
   0x9   :  { %262 = vmatpush3.msra.mxu0 %v23_v6  ;;  %271 = vmatpush3.msra.mxu1 %v123_v7  ;;  %v236_v21 = vld [vmem:[%s402_s4] ss:$0 sm:$0xff]  ;;  %s288_s2 = scalar_lea.vmem %s223_s23, 256  ;;  %p293_p1 = scmp.lt.s32.totalorder %s223_s23, %s223_s23 }
   0xa   :  { %264 = vmatmul.mubr.msk.f32.vlgmr.msra.gmra.mxu0 %vm34_vm0, %v22_v8  ;;  %272 = vmatprep.subr.mxu1 %v122_v9  ;;  %p289_p0 = scmp.ne.s32.totalorder %s223_s23, %s288_s2  ;;  %p294_p2 = scmp.lt.s32.totalorder %s288_s2, %s288_s2 }
   0xb   :  { %273 = vmatpush3.msra.mxu1 %v122_v9 }
   0xc   :  { %274 = vmatprep.subr.mxu1 %v121_v10  ;;  %p295_p3 = por %p294_p2, %p293_p1 }
   0xd   :  { %275 = vmatpush3.msra.mxu1 %v121_v10 }
   0xe   :  { %276 = vmatprep.subr.mxu1 %v120_v11  ;;  %p296_p4 = pnand %p295_p3, %p289_p0 }
   0xf   :  { %277 = vmatpush3.msra.mxu1 %v120_v11 }
  0x10   :  { %278 = vmatprep.subr.mxu1 %v119_v12 }
  0x11   :  { %279 = vmatpush3.msra.mxu1 %v119_v12 }
  0x12   :  { %280 = vmatprep.subr.mxu1 %v118_v13 }
  0x13   :  { %281 = vmatpush3.msra.mxu1 %v118_v13 }
  0xca   :  { %v265_v15 = vpop.f32.mrf.mxu0 }
  0xcb   :  { %v113_v16 = vadd.f32 %v265_v15, %v233_v14 }
  0xcc   :  { %v107_v17 = vpop.f32.mrf.mxu0 }
  0xcd   :  { %v108_v18 = vadd.f32 %v233_v14, %v107_v17  ;;  %v117_v20 = vmax.f32 %v113_v16, 0.0 }
  0xcf   :  { %v116_v19 = vmax.f32 %v108_v18, 0.0 }
  0xd1   :  { %282 = vmatprep.mubr.msk.f32.mxu1 %vm133_vm1, %v116_v19 }
  0xd2   :  { %283 = vmatmul.mubr.msk.f32.vlgmr.msra.gmra.mxu1 %vm133_vm1, %v117_v20 }
 0x192   :  { %v284_v22 = vpop.f32.mrf.mxu1 }
 0x193   :  { %v212_v23 = vadd.f32 %v284_v22, %v236_v21 }
 0x194   :  { %v206_v24 = vpop.f32.mrf.mxu1 }
 0x195   :  { %216 = vst.msk [vmem:[#allocation2 + $0x8] sm:$0xff] %vm34_vm0, %v212_v23  ;;  %v207_v25 = vadd.f32 %v236_v21, %v206_v24 }
 0x197   :  { %215 = vst.msk [vmem:[#allocation2] sm:$0xff] %vm34_vm0, %v207_v25 }
 0x198   :  { %299 = shalt.err (!%p296_p4)
}
 0x199   :  { %s311_s24 = smov 128   ;;  %s312_s4 = smov 8  }
 0x19a   :  { %228 = dma.vmem_to_hbm [thread:$0]  %s223_s23, 256, %s403_s5, [#allocation3], %s311_s24, %s311_s24, %s312_s4  }
 0x19b   :  { %308 = dma.done.wait [#allocation3], 256  }
 0x19c   :  { %309 = vsyncadd [#allocation3], 4294967040 }
 0x19d   :  { %232 = vsyncpa [#allocation3], 1 }

</bundles_post_ra>
